<compile_context>
chip_gen: v5e
topology: v5e:2x2
jax: 0.10.0
libtpu: 0.0.40
codegen_flags: <defaults>
</compile_context>

<pallas_src>
import math

import jax
import jax.numpy as jnp
from jax.experimental import pallas as pl
from jax.experimental.pallas import tpu as pltpu

MAX_LENGTH = 15
LANE = 128
SUBLANE_BF16 = 16


def _round_up(x, m):
    return (x + m - 1) // m * m


# ----------------------------------------------------------------------------
# Fused decoder-step kernel:
#   embedding gather -> attention (split bf16 matmuls) + softmax ->
#   attention-weighted sum (MXU, K=ML_ENC) -> combine (split bf16 matmuls) + relu ->
#   2-layer GRU cell (packed-gate matmuls) -> lane-padded output projection.
# ----------------------------------------------------------------------------
def _decoder_kernel(ids_ref,        # SMEM (B,) int32  (scalar prefetch)
                    h_ref,          # (2, B, H)  f32
                    enc_ref,        # (B, ML_ENC, H) bf16
                    emb_ref,        # (V, E)     f32
                    watt_ref,       # (2, H, ML_PAD) bf16  [0]=embedding part, [1]=h0 part
                    wcomb_ref,      # (2, H, H)  bf16      [0]=embedding part, [1]=applied part
                    wgru_ref,       # (4, H, 3H) bf16      [ih0, hh0, ih1, hh1]
                    bgru_ref,       # (4, 1, 3H) f32       [ih0, hh0, ih1, hh1]
                    wout_ref,       # (H, V_PAD) bf16
                    bias_ref,       # (3, 1, WB) f32       [b_att, b_comb, b_out]
                    logits_ref,     # (B, V_PAD) f32
                    hout_ref,       # (2, B, H)  f32
                    attn_ref):      # (B, ML_PAD) f32
    f32, bf16 = jnp.float32, jnp.bfloat16
    B = h_ref.shape[1]
    H = h_ref.shape[2]
    ML_ENC = enc_ref.shape[1]
    ML_PAD = attn_ref.shape[1]
    V_PAD = logits_ref.shape[1]

    # ---- Embedding lookup: dynamic row gather from the f32 VMEM table (no one-hot),
    #      cast to bf16 once for all downstream MXU uses.
    embedded = jnp.concatenate(
        [emb_ref[pl.ds(ids_ref[b], 1), :] for b in range(B)], axis=0).astype(bf16)  # (B, E)

    h0 = h_ref[0]                                                              # (B, H) f32
    h1 = h_ref[1]
    h0_b = h0.astype(bf16)
    h1_b = h1.astype(bf16)

    # ---- Attention logits: two bf16 matmuls (no lane-axis concat) + softmax.
    att = (jnp.dot(embedded, watt_ref[0], preferred_element_type=f32)
           + jnp.dot(h0_b, watt_ref[1], preferred_element_type=f32)
           + bias_ref[0][:, :ML_PAD])                                          # (B, ML_PAD)
    m = jnp.max(att, axis=1, keepdims=True)
    e = jnp.exp(att - m)                                                       # padded lanes -> 0
    pesos = e * pl.reciprocal(jnp.sum(e, axis=1, keepdims=True), approx=True)
    attn_ref[...] = pesos                                                      # lane-dense store

    # ---- Attention-weighted sum of encoder outputs on the MXU (K = ML_ENC = 16).
    #      B is static and tiny -> unrolled (1, ML_ENC) @ (ML_ENC, H) bf16 dots.
    pesos_b = pesos[:, :ML_ENC].astype(bf16)                                   # (B, ML_ENC)
    applied = jnp.concatenate(
        [jnp.dot(pesos_b[b:b + 1, :], enc_ref[b], preferred_element_type=f32)
         for b in range(B)], axis=0)                                           # (B, H) f32

    # ---- combinar_atencion + relu (split bf16 matmuls, no concat).
    x = (jnp.dot(embedded, wcomb_ref[0], preferred_element_type=f32)
         + jnp.dot(applied.astype(bf16), wcomb_ref[1], preferred_element_type=f32)
         + bias_ref[1][:, :H])
    x = jnp.maximum(x, 0.0)                                                    # (B, H) f32

    # ---- 2-layer GRU cell: one packed (B, 3H) matmul each for gi / gh per layer.
    #      PyTorch gate order (r, z, n) along the 3H output axis.
    def gru_cell(xin_b, h_f32, h_b, w_ih, w_hh, b_ih, b_hh):
        gi = jnp.dot(xin_b, w_ih, preferred_element_type=f32) + b_ih           # (B, 3H)
        gh = jnp.dot(h_b, w_hh, preferred_element_type=f32) + b_hh             # (B, 3H)
        r = jax.nn.sigmoid(gi[:, :H] + gh[:, :H])
        z = jax.nn.sigmoid(gi[:, H:2 * H] + gh[:, H:2 * H])
        n = jnp.tanh(gi[:, 2 * H:] + r * gh[:, 2 * H:])
        return (1.0 - z) * n + z * h_f32

    h0_new = gru_cell(x.astype(bf16), h0, h0_b,
                      wgru_ref[0], wgru_ref[1], bgru_ref[0], bgru_ref[1])
    h1_new = gru_cell(h0_new.astype(bf16), h1, h1_b,
                      wgru_ref[2], wgru_ref[3], bgru_ref[2], bgru_ref[3])
    hout_ref[0] = h0_new
    hout_ref[1] = h1_new

    # ---- Output projection (vocab axis zero-padded to V_PAD lanes -> dense store).
    logits_ref[...] = (jnp.dot(h1_new.astype(bf16), wout_ref[...],
                               preferred_element_type=f32)
                       + bias_ref[2][:, :V_PAD])


# ----------------------------------------------------------------------------
# Parameter construction (PyTorch-shaped, f32).
# ----------------------------------------------------------------------------
def init_params(key, vocab, embed, hidden, max_len=MAX_LENGTH):
    assert embed == hidden, "combinar_atencion / GRU input require embed == hidden"
    ks = jax.random.split(key, 16)
    s = 0.1
    return {
        "emb":    jax.random.normal(ks[0], (vocab, embed), jnp.float32) * s,
        # atencion: Linear(hidden + embed, max_len); first `embed` input features are
        # the embedding (torch.cat((embedded, oculta[0]), 1)).
        "W_att":  jax.random.normal(ks[1], (max_len, embed + hidden), jnp.float32) * s,
        "b_att":  jax.random.normal(ks[2], (max_len,), jnp.float32) * s,
        "W_comb": jax.random.normal(ks[3], (hidden, 2 * hidden), jnp.float32) * s,
        "b_comb": jax.random.normal(ks[4], (hidden,), jnp.float32) * s,
        "W_ih0":  jax.random.normal(ks[5], (3 * hidden, embed), jnp.float32) * s,
        "W_hh0":  jax.random.normal(ks[6], (3 * hidden, hidden), jnp.float32) * s,
        "b_ih0":  jax.random.normal(ks[7], (3 * hidden,), jnp.float32) * s,
        "b_hh0":  jax.random.normal(ks[8], (3 * hidden,), jnp.float32) * s,
        "W_ih1":  jax.random.normal(ks[9], (3 * hidden, hidden), jnp.float32) * s,
        "W_hh1":  jax.random.normal(ks[10], (3 * hidden, hidden), jnp.float32) * s,
        "b_ih1":  jax.random.normal(ks[11], (3 * hidden,), jnp.float32) * s,
        "b_hh1":  jax.random.normal(ks[12], (3 * hidden,), jnp.float32) * s,
        "W_out":  jax.random.normal(ks[13], (vocab, hidden), jnp.float32) * s,
        "b_out":  jax.random.normal(ks[14], (vocab,), jnp.float32) * s,
    }


# ----------------------------------------------------------------------------
# One-time weight preparation (hoisted out of the per-step path): transpose to
# (in, out), stack concat-splits / GRU gates / biases into packed arrays, pad the
# lane-facing output dims, cast the big matrices to bf16 (biases / embedding f32).
# ----------------------------------------------------------------------------
def prepare_params(params):
    f32, bf16 = jnp.float32, jnp.bfloat16
    V, E = params["emb"].shape
    H = params["b_comb"].shape[0]
    ML = params["b_att"].shape[0]
    assert E == H
    ML_PAD = _round_up(ML, LANE)            # attention-logit lane padding
    ML_ENC = _round_up(ML, SUBLANE_BF16)    # encoder sequence (contraction) padding
    V_PAD = _round_up(V, LANE)
    WB = max(ML_PAD, _round_up(H, LANE), V_PAD)

    def pad_cols(w, to):                    # zero-pad the (transposed) output axis
        return jnp.pad(w, ((0, 0), (0, to - w.shape[1])))

    # atencion: rows 0:E of W_att.T correspond to the embedding part of the concat.
    watt_t = params["W_att"].T                                           # (E + H, ML)
    w_att = jnp.stack([pad_cols(watt_t[:E], ML_PAD),
                       pad_cols(watt_t[E:], ML_PAD)]).astype(bf16)       # (2, H, ML_PAD)

    # combinar_atencion: rows 0:E of W_comb.T correspond to the embedding part.
    wcomb_t = params["W_comb"].T                                         # (2H, H)
    w_comb = jnp.stack([wcomb_t[:E], wcomb_t[E:]]).astype(bf16)          # (2, H, H)

    # GRU: transpose to (in, 3H), gate order (r, z, n) preserved along columns.
    w_gru = jnp.stack([params["W_ih0"].T, params["W_hh0"].T,
                       params["W_ih1"].T, params["W_hh1"].T]).astype(bf16)   # (4, H, 3H)
    b_gru = jnp.stack([params["b_ih0"], params["b_hh0"],
                       params["b_ih1"], params["b_hh1"]]
                      ).reshape(4, 1, 3 * H).astype(f32)                     # (4, 1, 3H)

    # Small biases packed into one buffer: [b_att, b_comb, b_out]; padded attention
    # lanes get a huge negative f32 bias -> softmax weight is exactly 0.
    def pad_vec(v, to):
        return jnp.pad(v.astype(f32), (0, to - v.shape[0]))
    b_att = pad_vec(jnp.full((ML_PAD,), -1e30, f32).at[:ML].set(params["b_att"]), WB)
    b_comb = pad_vec(params["b_comb"], WB)
    b_out = pad_vec(jnp.pad(params["b_out"], (0, V_PAD - V)), WB)
    biases = jnp.stack([b_att, b_comb, b_out]).reshape(3, 1, WB)             # (3, 1, WB)

    return {
        "emb":    params["emb"].astype(f32),                                 # exact gather
        "w_att":  w_att,
        "w_comb": w_comb,
        "w_gru":  w_gru,
        "b_gru":  b_gru,
        "w_out":  pad_cols(params["W_out"].T, V_PAD).astype(bf16),           # (H, V_PAD)
        "biases": biases,
        "dims":   dict(V=V, E=E, H=H, ML=ML, ML_PAD=ML_PAD, ML_ENC=ML_ENC,
                       V_PAD=V_PAD, WB=WB),
    }


def prepare_encoder_outputs(prepared, salidas_encoder):
    """Once per sequence (NOT per decode step): pad the encoder sequence axis to a
    bf16 sublane multiple and cast to bf16 (padded rows meet exactly-zero weights)."""
    d = prepared["dims"]
    pad = d["ML_ENC"] - salidas_encoder.shape[1]
    return jnp.pad(salidas_encoder.astype(jnp.float32),
                   ((0, 0), (0, pad), (0, 0))).astype(jnp.bfloat16)          # (B, ML_ENC, H)


def _full_block_spec(shape):
    zeros = (0,) * len(shape)
    return pl.BlockSpec(shape, lambda *_: zeros)


# ----------------------------------------------------------------------------
# Wrapper: thin per-call glue + pallas_call (weight & encoder prep live outside).
# ----------------------------------------------------------------------------
def atencion_decoder_forward(prepared, palabras_entrada, oculta, enc_prepared):
    d = prepared["dims"]
    V, H, ML, ML_ENC, ML_PAD, V_PAD = (d["V"], d["H"], d["ML"], d["ML_ENC"],
                                       d["ML_PAD"], d["V_PAD"])
    B = palabras_entrada.shape[0]
    L = oculta.shape[0]

    ids = palabras_entrada[:, 0].astype(jnp.int32)                           # (B,)
    oculta = oculta.astype(jnp.float32)

    args = (oculta, enc_prepared, prepared["emb"],
            prepared["w_att"], prepared["w_comb"],
            prepared["w_gru"], prepared["b_gru"],
            prepared["w_out"], prepared["biases"])

    out_shape = (
        jax.ShapeDtypeStruct((B, V_PAD), jnp.float32),    # logits (lane-padded)
        jax.ShapeDtypeStruct((L, B, H), jnp.float32),     # new hidden state
        jax.ShapeDtypeStruct((B, ML_PAD), jnp.float32),   # attention weights (lane-padded)
    )

    in_specs = [_full_block_spec(a.shape) for a in args]
    out_specs = tuple(_full_block_spec(s.shape) for s in out_shape)

    # Advisory cost estimate (rough MAC / transcendental / byte counts).
    flops = 2 * B * (2 * H * ML_PAD + ML_ENC * H + 2 * H * H
                     + 2 * 2 * H * 3 * H + H * V_PAD)
    transcendentals = B * (ML_PAD + 1 + 2 * 3 * H)
    bytes_accessed = (sum(int(a.size) * a.dtype.itemsize for a in args)
                      + int(ids.size) * 4
                      + sum(math.prod(s.shape) * s.dtype.itemsize for s in out_shape))

    grid_spec = pltpu.PrefetchScalarGridSpec(
        num_scalar_prefetch=1,           # token ids -> SMEM, drive the embedding gather
        grid=(1,),
        in_specs=in_specs,
        out_specs=out_specs,
    )

    logits_pad, oculta_new, pesos_pad = pl.pallas_call(
        _decoder_kernel,
        out_shape=out_shape,
        grid_spec=grid_spec,
        compiler_params=pltpu.CompilerParams(
            dimension_semantics=("arbitrary",),
            vmem_limit_bytes=32 * 1024 * 1024,
        ),
        cost_estimate=pl.CostEstimate(flops=flops,
                                      transcendentals=transcendentals,
                                      bytes_accessed=bytes_accessed),
    )(ids, *args)

    # Slice the lane padding back off in the wrapper (layout plumbing only).
    return logits_pad[:, :V], oculta_new, pesos_pad[:, :ML]


# ----------------------------------------------------------------------------
# Pure-JAX reference (mirrors the PyTorch module, f32 everywhere).
# ----------------------------------------------------------------------------
def reference_forward(params, palabras_entrada, oculta, salidas_encoder):
    embedded = params["emb"][palabras_entrada[:, 0]]                              # (B, E)
    h0, h1 = oculta[0], oculta[1]
    att = jnp.concatenate([embedded, h0], axis=1) @ params["W_att"].T + params["b_att"]
    pesos = jax.nn.softmax(att, axis=-1)
    applied = jnp.einsum("bl,blh->bh", pesos, salidas_encoder)
    x = jnp.concatenate([embedded, applied], axis=1) @ params["W_comb"].T + params["b_comb"]
    x = jnp.maximum(x, 0.0)

    def gru(x, h, wih, whh, bih, bhh):
        gi = x @ wih.T + bih
        gh = h @ whh.T + bhh
        H = h.shape[1]
        r = jax.nn.sigmoid(gi[:, :H] + gh[:, :H])
        z = jax.nn.sigmoid(gi[:, H:2 * H] + gh[:, H:2 * H])
        n = jnp.tanh(gi[:, 2 * H:] + r * gh[:, 2 * H:])
        return (1.0 - z) * n + z * h

    h0n = gru(x, h0, params["W_ih0"], params["W_hh0"], params["b_ih0"], params["b_hh0"])
    h1n = gru(h0n, h1, params["W_ih1"], params["W_hh1"], params["b_ih1"], params["b_hh1"])
    out = h1n @ params["W_out"].T + params["b_out"]
    return out, jnp.stack([h0n, h1n]), pesos


if __name__ == "__main__":
    B, V, E, H, ML, L = 2, 20, 32, 32, MAX_LENGTH, 2

    key = jax.random.PRNGKey(0)
    kp, kt, kh, ke = jax.random.split(key, 4)

    params = init_params(kp, vocab=V, embed=E, hidden=H, max_len=ML)
    prepared = prepare_params(params)          # one-time weight prep (hoisted)

    palabras_entrada = jax.random.randint(kt, (B, 1), 0, V, dtype=jnp.int32)   # token ids
    oculta = jax.random.normal(kh, (L, B, H), jnp.float32)                     # GRU hidden
    salidas_encoder = jax.random.normal(ke, (B, ML, H), jnp.float32)           # encoder outs

    # Hoisted once per sequence, NOT per decode step.
    enc_prepared = prepare_encoder_outputs(prepared, salidas_encoder)

    salida, oculta_new, pesos = atencion_decoder_forward(
        prepared, palabras_entrada, oculta, enc_prepared)
    jax.block_until_ready((salida, oculta_new, pesos))

    # Reference is pure f32; kernel uses bf16 MXU operands (f32 accumulation) and an
    # approximate EUP reciprocal in the softmax, so compare with a matching tolerance.
    r_salida, r_oculta, r_pesos = reference_forward(
        params, palabras_entrada, oculta, salidas_encoder)
    assert jnp.allclose(salida, r_salida, rtol=2e-2, atol=2e-2), "logits mismatch"
    assert jnp.allclose(oculta_new, r_oculta, rtol=2e-2, atol=2e-2), "hidden mismatch"
    assert jnp.allclose(pesos, r_pesos, rtol=2e-2, atol=2e-2), "attention mismatch"

    print("KERNEL_OK")
</pallas_src>

<mosaic_0001>
module attributes {stable_mosaic.version = 11 : i64} {
  func.func @_decoder_kernel(%arg0: i32, %arg1: memref<2xi32, #tpu.memory_space<smem>>, %arg2: memref<2x2x32xf32, #tpu.memory_space<vmem>>, %arg3: memref<2x16x32xbf16, #tpu.memory_space<vmem>>, %arg4: memref<20x32xf32, #tpu.memory_space<vmem>>, %arg5: memref<2x32x128xbf16, #tpu.memory_space<vmem>>, %arg6: memref<2x32x32xbf16, #tpu.memory_space<vmem>>, %arg7: memref<4x32x96xbf16, #tpu.memory_space<vmem>>, %arg8: memref<4x1x96xf32, #tpu.memory_space<vmem>>, %arg9: memref<32x128xbf16, #tpu.memory_space<vmem>>, %arg10: memref<3x1x128xf32, #tpu.memory_space<vmem>>, %arg11: memref<2x128xf32, #tpu.memory_space<vmem>>, %arg12: memref<2x2x32xf32, #tpu.memory_space<vmem>>, %arg13: memref<2x128xf32, #tpu.memory_space<vmem>>) attributes {dimension_semantics = [#tpu.dimension_semantics<arbitrary>], iteration_bounds = array<i64: 1>, scalar_prefetch = 1 : i64, scratch_operands = 0 : i64, tpu.core_type = #tpu.core_type<tc>, window_params = [{pipeline_mode = #tpu.pipeline_mode<synchronous>, transform_indices = @transform_0, window_bounds = array<i64: 2, 2, 32>}, {pipeline_mode = #tpu.pipeline_mode<synchronous>, transform_indices = @transform_1, window_bounds = array<i64: 2, 16, 32>}, {pipeline_mode = #tpu.pipeline_mode<synchronous>, transform_indices = @transform_2, window_bounds = array<i64: 20, 32>}, {pipeline_mode = #tpu.pipeline_mode<synchronous>, transform_indices = @transform_3, window_bounds = array<i64: 2, 32, 128>}, {pipeline_mode = #tpu.pipeline_mode<synchronous>, transform_indices = @transform_4, window_bounds = array<i64: 2, 32, 32>}, {pipeline_mode = #tpu.pipeline_mode<synchronous>, transform_indices = @transform_5, window_bounds = array<i64: 4, 32, 96>}, {pipeline_mode = #tpu.pipeline_mode<synchronous>, transform_indices = @transform_6, window_bounds = array<i64: 4, 1, 96>}, {pipeline_mode = #tpu.pipeline_mode<synchronous>, transform_indices = @transform_7, window_bounds = array<i64: 32, 128>}, {pipeline_mode = #tpu.pipeline_mode<synchronous>, transform_indices = @transform_8, window_bounds = array<i64: 3, 1, 128>}, {pipeline_mode = #tpu.pipeline_mode<synchronous>, transform_indices = @transform_9, window_bounds = array<i64: 2, 128>}, {pipeline_mode = #tpu.pipeline_mode<synchronous>, transform_indices = @transform_10, window_bounds = array<i64: 2, 2, 32>}, {pipeline_mode = #tpu.pipeline_mode<synchronous>, transform_indices = @transform_11, window_bounds = array<i64: 2, 128>}]} {
    %c0 = arith.constant 0 : index
    %0 = memref.load %arg1[%c0] : memref<2xi32, #tpu.memory_space<smem>>
    %1 = arith.index_cast %0 : i32 to index
    %c0_0 = arith.constant 0 : index
    %2 = vector.load %arg4[%1, %c0_0] : memref<20x32xf32, #tpu.memory_space<vmem>>, vector<1x32xf32>
    %c1 = arith.constant 1 : index
    %3 = memref.load %arg1[%c1] : memref<2xi32, #tpu.memory_space<smem>>
    %4 = arith.index_cast %3 : i32 to index
    %c0_1 = arith.constant 0 : index
    %5 = vector.load %arg4[%4, %c0_1] : memref<20x32xf32, #tpu.memory_space<vmem>>, vector<1x32xf32>
    %6 = tpu.concatenate %2, %5 in 0 : vector<1x32xf32>, vector<1x32xf32> -> vector<2x32xf32>
    %7 = arith.truncf %6 : vector<2x32xf32> to vector<2x32xbf16>
    %c0_2 = arith.constant 0 : index
    %c0_3 = arith.constant 0 : index
    %c0_4 = arith.constant 0 : index
    %8 = vector.load %arg2[%c0_2, %c0_3, %c0_4] : memref<2x2x32xf32, #tpu.memory_space<vmem>>, vector<1x2x32xf32>
    %9 = vector.shape_cast %8 : vector<1x2x32xf32> to vector<2x32xf32>
    %c1_5 = arith.constant 1 : index
    %c0_6 = arith.constant 0 : index
    %c0_7 = arith.constant 0 : index
    %10 = vector.load %arg2[%c1_5, %c0_6, %c0_7] : memref<2x2x32xf32, #tpu.memory_space<vmem>>, vector<1x2x32xf32>
    %11 = vector.shape_cast %10 : vector<1x2x32xf32> to vector<2x32xf32>
    %12 = arith.truncf %9 : vector<2x32xf32> to vector<2x32xbf16>
    %13 = arith.truncf %11 : vector<2x32xf32> to vector<2x32xbf16>
    %c0_8 = arith.constant 0 : index
    %c0_9 = arith.constant 0 : index
    %c0_10 = arith.constant 0 : index
    %14 = vector.load %arg5[%c0_8, %c0_9, %c0_10] : memref<2x32x128xbf16, #tpu.memory_space<vmem>>, vector<1x32x128xbf16>
    %15 = vector.shape_cast %14 : vector<1x32x128xbf16> to vector<32x128xbf16>
    %cst = arith.constant dense<0.000000e+00> : vector<2x128xf32>
    %16 = tpu.matmul %7, %15, %cst {dimension_numbers = #tpu.dot_dimension_numbers<[1], [0], [0], [1], [0, 0, 1, 1], [], []>} : vector<2x32xbf16>, vector<32x128xbf16>, vector<2x128xf32> -> vector<2x128xf32>
    %c1_11 = arith.constant 1 : index
    %c0_12 = arith.constant 0 : index
    %c0_13 = arith.constant 0 : index
    %17 = vector.load %arg5[%c1_11, %c0_12, %c0_13] : memref<2x32x128xbf16, #tpu.memory_space<vmem>>, vector<1x32x128xbf16>
    %18 = vector.shape_cast %17 : vector<1x32x128xbf16> to vector<32x128xbf16>
    %cst_14 = arith.constant dense<0.000000e+00> : vector<2x128xf32>
    %19 = tpu.matmul %12, %18, %cst_14 {dimension_numbers = #tpu.dot_dimension_numbers<[1], [0], [0], [1], [0, 0, 1, 1], [], []>} : vector<2x32xbf16>, vector<32x128xbf16>, vector<2x128xf32> -> vector<2x128xf32>
    %20 = arith.addf %16, %19 : vector<2x128xf32>
    %c0_15 = arith.constant 0 : index
    %c0_16 = arith.constant 0 : index
    %c0_17 = arith.constant 0 : index
    %21 = vector.load %arg10[%c0_15, %c0_16, %c0_17] : memref<3x1x128xf32, #tpu.memory_space<vmem>>, vector<1x1x128xf32>
    %22 = vector.shape_cast %21 : vector<1x1x128xf32> to vector<1x128xf32>
    %23 = vector.broadcast %22 : vector<1x128xf32> to vector<2x128xf32>
    %24 = arith.addf %20, %23 : vector<2x128xf32>
    %cst_18 = arith.constant dense<0xFF800000> : vector<2xf32>
    %25 = vector.multi_reduction <maximumf>, %24, %cst_18 [1] : vector<2x128xf32> to vector<2xf32>
    %26 = vector.shape_cast %25 : vector<2xf32> to vector<2x1xf32>
    %27 = vector.broadcast %26 : vector<2x1xf32> to vector<2x128xf32>
    %28 = arith.subf %24, %27 : vector<2x128xf32>
    %29 = math.exp %28 : vector<2x128xf32>
    %cst_19 = arith.constant dense<0.000000e+00> : vector<2xf32>
    %30 = vector.multi_reduction <add>, %29, %cst_19 [1] : vector<2x128xf32> to vector<2xf32>
    %31 = vector.shape_cast %30 : vector<2xf32> to vector<2x1xf32>
    %32 = tpu.reciprocal %31 {approx = true} : vector<2x1xf32> -> vector<2x1xf32>
    %33 = vector.broadcast %32 : vector<2x1xf32> to vector<2x128xf32>
    %34 = arith.mulf %29, %33 : vector<2x128xf32>
    %c0_20 = arith.constant 0 : index
    %c0_21 = arith.constant 0 : index
    %35 = vector.load %arg13[%c0_20, %c0_21] : memref<2x128xf32, #tpu.memory_space<vmem>>, vector<2x128xf32>
    tpu.vector_store %arg13[%c0_20, %c0_21], %34 {strides = array<i32>} : memref<2x128xf32, #tpu.memory_space<vmem>>, vector<2x128xf32>,
    %36 = vector.extract_strided_slice %34 {offsets = [0, 0], sizes = [2, 16], strides = [1, 1]} : vector<2x128xf32> to vector<2x16xf32>
    %37 = arith.truncf %36 : vector<2x16xf32> to vector<2x16xbf16>
    %38 = vector.extract_strided_slice %37 {offsets = [0, 0], sizes = [1, 16], strides = [1, 1]} : vector<2x16xbf16> to vector<1x16xbf16>
    %c0_22 = arith.constant 0 : index
    %c0_23 = arith.constant 0 : index
    %c0_24 = arith.constant 0 : index
    %39 = vector.load %arg3[%c0_22, %c0_23, %c0_24] : memref<2x16x32xbf16, #tpu.memory_space<vmem>>, vector<1x16x32xbf16>
    %40 = vector.shape_cast %39 : vector<1x16x32xbf16> to vector<16x32xbf16>
    %cst_25 = arith.constant dense<0.000000e+00> : vector<1x32xf32>
    %41 = tpu.matmul %38, %40, %cst_25 {dimension_numbers = #tpu.dot_dimension_numbers<[1], [0], [0], [1], [0, 0, 1, 1], [], []>} : vector<1x16xbf16>, vector<16x32xbf16>, vector<1x32xf32> -> vector<1x32xf32>
    %42 = vector.extract_strided_slice %37 {offsets = [1, 0], sizes = [1, 16], strides = [1, 1]} : vector<2x16xbf16> to vector<1x16xbf16>
    %c1_26 = arith.constant 1 : index
    %c0_27 = arith.constant 0 : index
    %c0_28 = arith.constant 0 : index
    %43 = vector.load %arg3[%c1_26, %c0_27, %c0_28] : memref<2x16x32xbf16, #tpu.memory_space<vmem>>, vector<1x16x32xbf16>
    %44 = vector.shape_cast %43 : vector<1x16x32xbf16> to vector<16x32xbf16>
    %cst_29 = arith.constant dense<0.000000e+00> : vector<1x32xf32>
    %45 = tpu.matmul %42, %44, %cst_29 {dimension_numbers = #tpu.dot_dimension_numbers<[1], [0], [0], [1], [0, 0, 1, 1], [], []>} : vector<1x16xbf16>, vector<16x32xbf16>, vector<1x32xf32> -> vector<1x32xf32>
    %46 = tpu.concatenate %41, %45 in 0 : vector<1x32xf32>, vector<1x32xf32> -> vector<2x32xf32>
    %c0_30 = arith.constant 0 : index
    %c0_31 = arith.constant 0 : index
    %c0_32 = arith.constant 0 : index
    %47 = vector.load %arg6[%c0_30, %c0_31, %c0_32] : memref<2x32x32xbf16, #tpu.memory_space<vmem>>, vector<1x32x32xbf16>
    %48 = vector.shape_cast %47 : vector<1x32x32xbf16> to vector<32x32xbf16>
    %cst_33 = arith.constant dense<0.000000e+00> : vector<2x32xf32>
    %49 = tpu.matmul %7, %48, %cst_33 {dimension_numbers = #tpu.dot_dimension_numbers<[1], [0], [0], [1], [0, 0, 1, 1], [], []>} : vector<2x32xbf16>, vector<32x32xbf16>, vector<2x32xf32> -> vector<2x32xf32>
    %50 = arith.truncf %46 : vector<2x32xf32> to vector<2x32xbf16>
    %c1_34 = arith.constant 1 : index
    %c0_35 = arith.constant 0 : index
    %c0_36 = arith.constant 0 : index
    %51 = vector.load %arg6[%c1_34, %c0_35, %c0_36] : memref<2x32x32xbf16, #tpu.memory_space<vmem>>, vector<1x32x32xbf16>
    %52 = vector.shape_cast %51 : vector<1x32x32xbf16> to vector<32x32xbf16>
    %cst_37 = arith.constant dense<0.000000e+00> : vector<2x32xf32>
    %53 = tpu.matmul %50, %52, %cst_37 {dimension_numbers = #tpu.dot_dimension_numbers<[1], [0], [0], [1], [0, 0, 1, 1], [], []>} : vector<2x32xbf16>, vector<32x32xbf16>, vector<2x32xf32> -> vector<2x32xf32>
    %54 = arith.addf %49, %53 : vector<2x32xf32>
    %c1_38 = arith.constant 1 : index
    %c0_39 = arith.constant 0 : index
    %c0_40 = arith.constant 0 : index
    %55 = vector.load %arg10[%c1_38, %c0_39, %c0_40] : memref<3x1x128xf32, #tpu.memory_space<vmem>>, vector<1x1x128xf32>
    %56 = vector.shape_cast %55 : vector<1x1x128xf32> to vector<1x128xf32>
    %57 = vector.extract_strided_slice %56 {offsets = [0, 0], sizes = [1, 32], strides = [1, 1]} : vector<1x128xf32> to vector<1x32xf32>
    %58 = vector.broadcast %57 : vector<1x32xf32> to vector<2x32xf32>
    %59 = arith.addf %54, %58 : vector<2x32xf32>
    %cst_41 = arith.constant 0.000000e+00 : f32
    %60 = vector.broadcast %cst_41 : f32 to vector<2x32xf32>
    %61 = arith.maximumf %59, %60 : vector<2x32xf32>
    %62 = arith.truncf %61 : vector<2x32xf32> to vector<2x32xbf16>
    %c0_42 = arith.constant 0 : index
    %c0_43 = arith.constant 0 : index
    %c0_44 = arith.constant 0 : index
    %63 = vector.load %arg7[%c0_42, %c0_43, %c0_44] : memref<4x32x96xbf16, #tpu.memory_space<vmem>>, vector<1x32x96xbf16>
    %64 = vector.shape_cast %63 : vector<1x32x96xbf16> to vector<32x96xbf16>
    %c1_45 = arith.constant 1 : index
    %c0_46 = arith.constant 0 : index
    %c0_47 = arith.constant 0 : index
    %65 = vector.load %arg7[%c1_45, %c0_46, %c0_47] : memref<4x32x96xbf16, #tpu.memory_space<vmem>>, vector<1x32x96xbf16>
    %66 = vector.shape_cast %65 : vector<1x32x96xbf16> to vector<32x96xbf16>
    %c0_48 = arith.constant 0 : index
    %c0_49 = arith.constant 0 : index
    %c0_50 = arith.constant 0 : index
    %67 = vector.load %arg8[%c0_48, %c0_49, %c0_50] : memref<4x1x96xf32, #tpu.memory_space<vmem>>, vector<1x1x96xf32>
    %68 = vector.shape_cast %67 : vector<1x1x96xf32> to vector<1x96xf32>
    %c1_51 = arith.constant 1 : index
    %c0_52 = arith.constant 0 : index
    %c0_53 = arith.constant 0 : index
    %69 = vector.load %arg8[%c1_51, %c0_52, %c0_53] : memref<4x1x96xf32, #tpu.memory_space<vmem>>, vector<1x1x96xf32>
    %70 = vector.shape_cast %69 : vector<1x1x96xf32> to vector<1x96xf32>
    %cst_54 = arith.constant dense<0.000000e+00> : vector<2x96xf32>
    %71 = tpu.matmul %62, %64, %cst_54 {dimension_numbers = #tpu.dot_dimension_numbers<[1], [0], [0], [1], [0, 0, 1, 1], [], []>} : vector<2x32xbf16>, vector<32x96xbf16>, vector<2x96xf32> -> vector<2x96xf32>
    %72 = vector.broadcast %68 : vector<1x96xf32> to vector<2x96xf32>
    %73 = arith.addf %71, %72 : vector<2x96xf32>
    %cst_55 = arith.constant dense<0.000000e+00> : vector<2x96xf32>
    %74 = tpu.matmul %12, %66, %cst_55 {dimension_numbers = #tpu.dot_dimension_numbers<[1], [0], [0], [1], [0, 0, 1, 1], [], []>} : vector<2x32xbf16>, vector<32x96xbf16>, vector<2x96xf32> -> vector<2x96xf32>
    %75 = vector.broadcast %70 : vector<1x96xf32> to vector<2x96xf32>
    %76 = arith.addf %74, %75 : vector<2x96xf32>
    %77 = vector.extract_strided_slice %73 {offsets = [0, 0], sizes = [2, 32], strides = [1, 1]} : vector<2x96xf32> to vector<2x32xf32>
    %78 = vector.extract_strided_slice %76 {offsets = [0, 0], sizes = [2, 32], strides = [1, 1]} : vector<2x96xf32> to vector<2x32xf32>
    %79 = arith.addf %77, %78 : vector<2x32xf32>
    %80 = arith.negf %79 : vector<2x32xf32>
    %81 = math.exp %80 : vector<2x32xf32>
    %cst_56 = arith.constant 1.000000e+00 : f32
    %82 = vector.broadcast %cst_56 : f32 to vector<2x32xf32>
    %83 = arith.addf %82, %81 : vector<2x32xf32>
    %84 = arith.divf %82, %83 : vector<2x32xf32>
    %85 = vector.extract_strided_slice %73 {offsets = [0, 32], sizes = [2, 32], strides = [1, 1]} : vector<2x96xf32> to vector<2x32xf32>
    %86 = vector.extract_strided_slice %76 {offsets = [0, 32], sizes = [2, 32], strides = [1, 1]} : vector<2x96xf32> to vector<2x32xf32>
    %87 = arith.addf %85, %86 : vector<2x32xf32>
    %88 = arith.negf %87 : vector<2x32xf32>
    %89 = math.exp %88 : vector<2x32xf32>
    %cst_57 = arith.constant 1.000000e+00 : f32
    %90 = vector.broadcast %cst_57 : f32 to vector<2x32xf32>
    %91 = arith.addf %90, %89 : vector<2x32xf32>
    %92 = arith.divf %90, %91 : vector<2x32xf32>
    %93 = vector.extract_strided_slice %73 {offsets = [0, 64], sizes = [2, 32], strides = [1, 1]} : vector<2x96xf32> to vector<2x32xf32>
    %94 = vector.extract_strided_slice %76 {offsets = [0, 64], sizes = [2, 32], strides = [1, 1]} : vector<2x96xf32> to vector<2x32xf32>
    %95 = arith.mulf %84, %94 : vector<2x32xf32>
    %96 = arith.addf %93, %95 : vector<2x32xf32>
    %97 = math.tanh %96 : vector<2x32xf32>
    %cst_58 = arith.constant 1.000000e+00 : f32
    %98 = vector.broadcast %cst_58 : f32 to vector<2x32xf32>
    %99 = arith.subf %98, %92 : vector<2x32xf32>
    %100 = arith.mulf %99, %97 : vector<2x32xf32>
    %101 = arith.mulf %92, %9 : vector<2x32xf32>
    %102 = arith.addf %100, %101 : vector<2x32xf32>
    %103 = arith.truncf %102 : vector<2x32xf32> to vector<2x32xbf16>
    %c2 = arith.constant 2 : index
    %c0_59 = arith.constant 0 : index
    %c0_60 = arith.constant 0 : index
    %104 = vector.load %arg7[%c2, %c0_59, %c0_60] : memref<4x32x96xbf16, #tpu.memory_space<vmem>>, vector<1x32x96xbf16>
    %105 = vector.shape_cast %104 : vector<1x32x96xbf16> to vector<32x96xbf16>
    %c3 = arith.constant 3 : index
    %c0_61 = arith.constant 0 : index
    %c0_62 = arith.constant 0 : index
    %106 = vector.load %arg7[%c3, %c0_61, %c0_62] : memref<4x32x96xbf16, #tpu.memory_space<vmem>>, vector<1x32x96xbf16>
    %107 = vector.shape_cast %106 : vector<1x32x96xbf16> to vector<32x96xbf16>
    %c2_63 = arith.constant 2 : index
    %c0_64 = arith.constant 0 : index
    %c0_65 = arith.constant 0 : index
    %108 = vector.load %arg8[%c2_63, %c0_64, %c0_65] : memref<4x1x96xf32, #tpu.memory_space<vmem>>, vector<1x1x96xf32>
    %109 = vector.shape_cast %108 : vector<1x1x96xf32> to vector<1x96xf32>
    %c3_66 = arith.constant 3 : index
    %c0_67 = arith.constant 0 : index
    %c0_68 = arith.constant 0 : index
    %110 = vector.load %arg8[%c3_66, %c0_67, %c0_68] : memref<4x1x96xf32, #tpu.memory_space<vmem>>, vector<1x1x96xf32>
    %111 = vector.shape_cast %110 : vector<1x1x96xf32> to vector<1x96xf32>
    %cst_69 = arith.constant dense<0.000000e+00> : vector<2x96xf32>
    %112 = tpu.matmul %103, %105, %cst_69 {dimension_numbers = #tpu.dot_dimension_numbers<[1], [0], [0], [1], [0, 0, 1, 1], [], []>} : vector<2x32xbf16>, vector<32x96xbf16>, vector<2x96xf32> -> vector<2x96xf32>
    %113 = vector.broadcast %109 : vector<1x96xf32> to vector<2x96xf32>
    %114 = arith.addf %112, %113 : vector<2x96xf32>
    %cst_70 = arith.constant dense<0.000000e+00> : vector<2x96xf32>
    %115 = tpu.matmul %13, %107, %cst_70 {dimension_numbers = #tpu.dot_dimension_numbers<[1], [0], [0], [1], [0, 0, 1, 1], [], []>} : vector<2x32xbf16>, vector<32x96xbf16>, vector<2x96xf32> -> vector<2x96xf32>
    %116 = vector.broadcast %111 : vector<1x96xf32> to vector<2x96xf32>
    %117 = arith.addf %115, %116 : vector<2x96xf32>
    %118 = vector.extract_strided_slice %114 {offsets = [0, 0], sizes = [2, 32], strides = [1, 1]} : vector<2x96xf32> to vector<2x32xf32>
    %119 = vector.extract_strided_slice %117 {offsets = [0, 0], sizes = [2, 32], strides = [1, 1]} : vector<2x96xf32> to vector<2x32xf32>
    %120 = arith.addf %118, %119 : vector<2x32xf32>
    %121 = arith.negf %120 : vector<2x32xf32>
    %122 = math.exp %121 : vector<2x32xf32>
    %cst_71 = arith.constant 1.000000e+00 : f32
    %123 = vector.broadcast %cst_71 : f32 to vector<2x32xf32>
    %124 = arith.addf %123, %122 : vector<2x32xf32>
    %125 = arith.divf %123, %124 : vector<2x32xf32>
    %126 = vector.extract_strided_slice %114 {offsets = [0, 32], sizes = [2, 32], strides = [1, 1]} : vector<2x96xf32> to vector<2x32xf32>
    %127 = vector.extract_strided_slice %117 {offsets = [0, 32], sizes = [2, 32], strides = [1, 1]} : vector<2x96xf32> to vector<2x32xf32>
    %128 = arith.addf %126, %127 : vector<2x32xf32>
    %129 = arith.negf %128 : vector<2x32xf32>
    %130 = math.exp %129 : vector<2x32xf32>
    %cst_72 = arith.constant 1.000000e+00 : f32
    %131 = vector.broadcast %cst_72 : f32 to vector<2x32xf32>
    %132 = arith.addf %131, %130 : vector<2x32xf32>
    %133 = arith.divf %131, %132 : vector<2x32xf32>
    %134 = vector.extract_strided_slice %114 {offsets = [0, 64], sizes = [2, 32], strides = [1, 1]} : vector<2x96xf32> to vector<2x32xf32>
    %135 = vector.extract_strided_slice %117 {offsets = [0, 64], sizes = [2, 32], strides = [1, 1]} : vector<2x96xf32> to vector<2x32xf32>
    %136 = arith.mulf %125, %135 : vector<2x32xf32>
    %137 = arith.addf %134, %136 : vector<2x32xf32>
    %138 = math.tanh %137 : vector<2x32xf32>
    %cst_73 = arith.constant 1.000000e+00 : f32
    %139 = vector.broadcast %cst_73 : f32 to vector<2x32xf32>
    %140 = arith.subf %139, %133 : vector<2x32xf32>
    %141 = arith.mulf %140, %138 : vector<2x32xf32>
    %142 = arith.mulf %133, %11 : vector<2x32xf32>
    %143 = arith.addf %141, %142 : vector<2x32xf32>
    %c0_74 = arith.constant 0 : index
    %c0_75 = arith.constant 0 : index
    %c0_76 = arith.constant 0 : index
    %144 = vector.load %arg12[%c0_74, %c0_75, %c0_76] : memref<2x2x32xf32, #tpu.memory_space<vmem>>, vector<1x2x32xf32>
    %145 = vector.shape_cast %144 : vector<1x2x32xf32> to vector<2x32xf32>
    %146 = vector.shape_cast %102 : vector<2x32xf32> to vector<1x2x32xf32>
    tpu.vector_store %arg12[%c0_74, %c0_75, %c0_76], %146 {strides = array<i32>} : memref<2x2x32xf32, #tpu.memory_space<vmem>>, vector<1x2x32xf32>,
    %c1_77 = arith.constant 1 : index
    %c0_78 = arith.constant 0 : index
    %c0_79 = arith.constant 0 : index
    %147 = vector.load %arg12[%c1_77, %c0_78, %c0_79] : memref<2x2x32xf32, #tpu.memory_space<vmem>>, vector<1x2x32xf32>
    %148 = vector.shape_cast %147 : vector<1x2x32xf32> to vector<2x32xf32>
    %149 = vector.shape_cast %143 : vector<2x32xf32> to vector<1x2x32xf32>
    tpu.vector_store %arg12[%c1_77, %c0_78, %c0_79], %149 {strides = array<i32>} : memref<2x2x32xf32, #tpu.memory_space<vmem>>, vector<1x2x32xf32>,
    %150 = arith.truncf %143 : vector<2x32xf32> to vector<2x32xbf16>
    %c0_80 = arith.constant 0 : index
    %c0_81 = arith.constant 0 : index
    %151 = vector.load %arg9[%c0_80, %c0_81] : memref<32x128xbf16, #tpu.memory_space<vmem>>, vector<32x128xbf16>
    %cst_82 = arith.constant dense<0.000000e+00> : vector<2x128xf32>
    %152 = tpu.matmul %150, %151, %cst_82 {dimension_numbers = #tpu.dot_dimension_numbers<[1], [0], [0], [1], [0, 0, 1, 1], [], []>} : vector<2x32xbf16>, vector<32x128xbf16>, vector<2x128xf32> -> vector<2x128xf32>
    %c2_83 = arith.constant 2 : index
    %c0_84 = arith.constant 0 : index
    %c0_85 = arith.constant 0 : index
    %153 = vector.load %arg10[%c2_83, %c0_84, %c0_85] : memref<3x1x128xf32, #tpu.memory_space<vmem>>, vector<1x1x128xf32>
    %154 = vector.shape_cast %153 : vector<1x1x128xf32> to vector<1x128xf32>
    %155 = vector.broadcast %154 : vector<1x128xf32> to vector<2x128xf32>
    %156 = arith.addf %152, %155 : vector<2x128xf32>
    %c0_86 = arith.constant 0 : index
    %c0_87 = arith.constant 0 : index
    %157 = vector.load %arg11[%c0_86, %c0_87] : memref<2x128xf32, #tpu.memory_space<vmem>>, vector<2x128xf32>
    tpu.vector_store %arg11[%c0_86, %c0_87], %156 {strides = array<i32>} : memref<2x128xf32, #tpu.memory_space<vmem>>, vector<2x128xf32>,
    return
  }
  func.func @transform_0(%arg0: i32, %arg1: memref<2xi32, #tpu.memory_space<smem>>) -> (i32, i32, i32) {
    %c0_i32 = arith.constant 0 : i32
    %c0_i32_0 = arith.constant 0 : i32
    %c0_i32_1 = arith.constant 0 : i32
    %c0_i32_2 = arith.constant 0 : i32
    return %c0_i32, %c0_i32_0, %c0_i32_1 : i32, i32, i32
  }
  func.func @transform_1(%arg0: i32, %arg1: memref<2xi32, #tpu.memory_space<smem>>) -> (i32, i32, i32) {
    %c0_i32 = arith.constant 0 : i32
    %c0_i32_0 = arith.constant 0 : i32
    %c0_i32_1 = arith.constant 0 : i32
    %c0_i32_2 = arith.constant 0 : i32
    return %c0_i32, %c0_i32_0, %c0_i32_1 : i32, i32, i32
  }
  func.func @transform_2(%arg0: i32, %arg1: memref<2xi32, #tpu.memory_space<smem>>) -> (i32, i32) {
    %c0_i32 = arith.constant 0 : i32
    %c0_i32_0 = arith.constant 0 : i32
    %c0_i32_1 = arith.constant 0 : i32
    return %c0_i32, %c0_i32_0 : i32, i32
  }
  func.func @transform_3(%arg0: i32, %arg1: memref<2xi32, #tpu.memory_space<smem>>) -> (i32, i32, i32) {
    %c0_i32 = arith.constant 0 : i32
    %c0_i32_0 = arith.constant 0 : i32
    %c0_i32_1 = arith.constant 0 : i32
    %c0_i32_2 = arith.constant 0 : i32
    return %c0_i32, %c0_i32_0, %c0_i32_1 : i32, i32, i32
  }
  func.func @transform_4(%arg0: i32, %arg1: memref<2xi32, #tpu.memory_space<smem>>) -> (i32, i32, i32) {
    %c0_i32 = arith.constant 0 : i32
    %c0_i32_0 = arith.constant 0 : i32
    %c0_i32_1 = arith.constant 0 : i32
    %c0_i32_2 = arith.constant 0 : i32
    return %c0_i32, %c0_i32_0, %c0_i32_1 : i32, i32, i32
  }
  func.func @transform_5(%arg0: i32, %arg1: memref<2xi32, #tpu.memory_space<smem>>) -> (i32, i32, i32) {
    %c0_i32 = arith.constant 0 : i32
    %c0_i32_0 = arith.constant 0 : i32
    %c0_i32_1 = arith.constant 0 : i32
    %c0_i32_2 = arith.constant 0 : i32
    return %c0_i32, %c0_i32_0, %c0_i32_1 : i32, i32, i32
  }
  func.func @transform_6(%arg0: i32, %arg1: memref<2xi32, #tpu.memory_space<smem>>) -> (i32, i32, i32) {
    %c0_i32 = arith.constant 0 : i32
    %c0_i32_0 = arith.constant 0 : i32
    %c0_i32_1 = arith.constant 0 : i32
    %c0_i32_2 = arith.constant 0 : i32
    return %c0_i32, %c0_i32_0, %c0_i32_1 : i32, i32, i32
  }
  func.func @transform_7(%arg0: i32, %arg1: memref<2xi32, #tpu.memory_space<smem>>) -> (i32, i32) {
    %c0_i32 = arith.constant 0 : i32
    %c0_i32_0 = arith.constant 0 : i32
    %c0_i32_1 = arith.constant 0 : i32
    return %c0_i32, %c0_i32_0 : i32, i32
  }
  func.func @transform_8(%arg0: i32, %arg1: memref<2xi32, #tpu.memory_space<smem>>) -> (i32, i32, i32) {
    %c0_i32 = arith.constant 0 : i32
    %c0_i32_0 = arith.constant 0 : i32
    %c0_i32_1 = arith.constant 0 : i32
    %c0_i32_2 = arith.constant 0 : i32
    return %c0_i32, %c0_i32_0, %c0_i32_1 : i32, i32, i32
  }
  func.func @transform_9(%arg0: i32, %arg1: memref<2xi32, #tpu.memory_space<smem>>) -> (i32, i32) {
    %c0_i32 = arith.constant 0 : i32
    %c0_i32_0 = arith.constant 0 : i32
    %c0_i32_1 = arith.constant 0 : i32
    return %c0_i32, %c0_i32_0 : i32, i32
  }
  func.func @transform_10(%arg0: i32, %arg1: memref<2xi32, #tpu.memory_space<smem>>) -> (i32, i32, i32) {
    %c0_i32 = arith.constant 0 : i32
    %c0_i32_0 = arith.constant 0 : i32
    %c0_i32_1 = arith.constant 0 : i32
    %c0_i32_2 = arith.constant 0 : i32
    return %c0_i32, %c0_i32_0, %c0_i32_1 : i32, i32, i32
  }
  func.func @transform_11(%arg0: i32, %arg1: memref<2xi32, #tpu.memory_space<smem>>) -> (i32, i32) {
    %c0_i32 = arith.constant 0 : i32
    %c0_i32_0 = arith.constant 0 : i32
    %c0_i32_1 = arith.constant 0 : i32
    return %c0_i32, %c0_i32_0 : i32, i32
  }
}

</mosaic_0001>

<bundles_post_ra>
// kernel: tpu_custom_call.1
= control target key start
LH: loop header
LB: loop body
LE: loop exit
PB: predicated region body
PF: predicated region fallthrough
CT: control target
= control target key end

     0   :  { %s1161_s24 = smov [#allocation3]   ;;  %s1349_s0 = inlined_call_operand.hbm [shape: s32[2], index: 0, kind: input, shape index: {}]   ;;  %s1350_s1 = inlined_call_operand.hbm [shape: f32[2,2,32], index: 1, kind: input, shape index: {}]   ;;  %s1351_s2 = inlined_call_operand.hbm [shape: bf16[2,16,32], index: 2, kind: input, shape index: {}]   ;;  %s1352_s3 = inlined_call_operand.hbm [shape: f32[20,32], index: 3, kind: input, shape index: {}]   ;;  %s1353_s4 = inlined_call_operand.hbm [shape: bf16[2,32,128], index: 4, kind: input, shape index: {}]   ;;  %s1354_s5 = inlined_call_operand.hbm [shape: bf16[2,32,32], index: 5, kind: input, shape index: {}]   ;;  %s1355_s6 = inlined_call_operand.hbm [shape: bf16[4,32,96], index: 6, kind: input, shape index: {}]   ;;  %s1356_s7 = inlined_call_operand.vmem [shape: f32[4,1,96], index: 7, kind: input, shape index: {}]   ;;  %s1357_s8 = inlined_call_operand.hbm [shape: bf16[32,128], index: 8, kind: input, shape index: {}]   ;;  %s1358_s9 = inlined_call_operand.vmem [shape: f32[3,1,128], index: 9, kind: input, shape index: {}]   ;;  %s1359_s10 = inlined_call_operand.hbm [shape: f32[2,128], index: 10, kind: output, shape index: {0}]   ;;  %s1360_s11 = inlined_call_operand.hbm [shape: f32[2,2,32], index: 11, kind: output, shape index: {1}]   ;;  %s1361_s12 = inlined_call_operand.hbm [shape: f32[2,128], index: 12, kind: output, shape index: {2}]  }
   0x1   :  { %s19_s23 = sshll.u32 %s1349_s0, 4  ;;  %s20_s23 = int_to_ptr.hbm [resolvable:$true] %s19_s23 }
   0x2   :  { %22 = dma.hbm_to_smem %s20_s23, 16, %s1161_s24, [#allocation2] }
   0x3   :  { %1147 = dma.done.wait [#allocation2], 16 }
   0x4   :  { %1148 = vsyncadd [#allocation2], 4294967280 }
   0x5   :  { %25 = sfence }
   0x6   :  { %26 = vsyncpa [#allocation5], 0 }
   0x7   :  { %27 = vsyncpa [#allocation8], 0 }
   0x8   :  { %28 = vsyncpa [#allocation11], 0 }
   0x9   :  { %29 = vsyncpa [#allocation14], 0 }
   0xa   :  { %30 = vsyncpa [#allocation6], 0  ;;  %s49_s27 = sshll.u32 %s1351_s2, 4  ;;  %s50_s27 = int_to_ptr.hbm [resolvable:$true] %s49_s27 }
   0xb   :  { %31 = vsyncpa [#allocation18], 0  ;;  %s1162_s28 = smov [#allocation7]   ;;  %s75_s13 = sshll.u32 %s1353_s4, 4  ;;  %s76_s13 = int_to_ptr.hbm [resolvable:$true] %s75_s13 }
   0xc   :  { %s51_s29 = sshll.u32 %s1162_s28, 4  ;;  %s1163_s14 = smov 64   ;;  %s52_s29 = int_to_ptr.vmem [resolvable:$true] %s51_s29 }
   0xd   :  { %s1164_s15 = smov 4   ;;  %s1165_s16 = smov [#allocation10]  }
   0xe   :  { %57 = dma.hbm_to_vmem [thread:$0]  %s50_s27, 256, %s52_s29, [#allocation8], %s1163_s14, %s1163_s14, %s1164_s15  }
   0xf   :  { %s77_s17 = sshll.u32 %s1165_s16, 4  ;;  %s101_s19 = sshll.u32 %s1355_s6, 4  ;;  %s78_s17 = int_to_ptr.vmem [resolvable:$true] %s77_s17  ;;  %s102_s19 = int_to_ptr.hbm [resolvable:$true] %s101_s19 }
  0x10   :  { %83 = dma.hbm_to_vmem [thread:$0]  %s76_s13, 512, %s78_s17, [#allocation11], %s1163_s14, %s1163_s14, %s1164_s15  }
  0x11   :  { %s36_s21 = sshll.u32 %s1350_s1, 4  ;;  %s1166_s22 = smov [#allocation13]   ;;  %s37_s21 = int_to_ptr.hbm [resolvable:$true] %s36_s21 }
  0x12   :  { %s103_s23 = sshll.u32 %s1166_s22, 4  ;;  %s1167_s24 = smov [#allocation4]   ;;  %s104_s23 = int_to_ptr.vmem [resolvable:$true] %s103_s23 }
  0x13   :  { %109 = dma.hbm_to_vmem [thread:$0]  %s102_s19, 1024, %s104_s23, [#allocation14], %s1163_s14, %s1163_s14, %s1164_s15  }
  0x14   :  { %s38_s6 = sshll.u32 %s1167_s24, 4  ;;  %s1168_s25 = smov 32   ;;  %s39_s6 = int_to_ptr.vmem [resolvable:$true] %s38_s6 }
  0x15   :  { %s1169_s26 = smov 2   ;;  %s62_s1 = sshll.u32 %s1352_s3, 4  ;;  %s63_s1 = int_to_ptr.hbm [resolvable:$true] %s62_s1 }
  0x16   :  { %44 = dma.hbm_to_vmem [thread:$0]  %s37_s21, 64, %s39_s6, [#allocation5], %s1168_s25, %s1168_s25, %s1169_s26  }
  0x17   :  { %s1170_s29 = smov [#allocation9]   ;;  %s88_s16 = sshll.u32 %s1354_s5, 4  ;;  %s89_s16 = int_to_ptr.hbm [resolvable:$true] %s88_s16 }
  0x18   :  { %s64_s0 = sshll.u32 %s1170_s29, 4  ;;  %s1171_s17 = smov 128   ;;  %s65_s0 = int_to_ptr.vmem [resolvable:$true] %s64_s0 }
  0x19   :  { %s1172_s18 = smov 8   ;;  %s1173_s2 = smov [#allocation12]  }
  0x1a   :  { %70 = dma.hbm_to_vmem [thread:$0]  %s63_s1, 384, %s65_s0, [#allocation8], %s1171_s17, %s1171_s17, %s1172_s18  }
  0x1b   :  { %s90_s19 = sshll.u32 %s1173_s2, 4  ;;  %s116_s21 = sshll.u32 %s1357_s8, 4  ;;  %s91_s19 = int_to_ptr.vmem [resolvable:$true] %s90_s19  ;;  %s117_s21 = int_to_ptr.hbm [resolvable:$true] %s116_s21 }
  0x1c   :  { %96 = dma.hbm_to_vmem [thread:$0]  %s89_s16, 512, %s91_s19, [#allocation11], %s1163_s14, %s1163_s14, %s1164_s15  }
  0x1d   :  { %s1174_s3 = smov [#allocation15]  }
  0x1e   :  { %s118_s22 = sshll.u32 %s1174_s3, 4  ;;  %s119_s22 = int_to_ptr.vmem [resolvable:$true] %s118_s22 }
  0x1f   :  { %124 = dma.hbm_to_vmem [thread:$0]  %s117_s21, 256, %s119_s22, [#allocation14], %s1163_s14, %s1163_s14, %s1164_s15  }
  0x20   :  { %1149 = dma.done.wait [#allocation5], 64  }
  0x21   :  { %1150 = vsyncadd [#allocation5], 4294967232 }
  0x22   :  { %1151 = dma.done.wait [#allocation8], 640  }
  0x23   :  { %1152 = vsyncadd [#allocation8], 4294966656 }
  0x24   :  { %1153 = dma.done.wait [#allocation11], 1024  }
  0x25   :  { %1154 = vsyncadd [#allocation11], 4294966272 }
  0x26   :  { %1155 = dma.done.wait [#allocation14], 1280  }
  0x27   :  { %1156 = vsyncadd [#allocation14], 4294966016  ;;  %s156_s5 = sld [smem:[#allocation3]]  ;;  %v837_v0 = vld [vmem:[#allocation10 + $0x18] sm:$0xff]  ;;  %v835_v1 = vld [vmem:[#allocation10 + $0x8] sm:$0xff]  ;;  %vm165_vm0 = vcmask 1040384  }
  0x28   :  { %s735_s8 = sld [smem:[#allocation3 + $0x1]]  ;;  %v836_v2 = vld [vmem:[#allocation10 + $0x10] sm:$0xff]  ;;  %v834_v3 = vld [vmem:[#allocation10] sm:$0xff]  ;;  %204 = vmatpush.bf16.msra.mxu0 %v837_v0  ;;  %232 = vmatpush.bf16.msra.mxu1 %v835_v1  ;;  %vm194_vm1 = vcmask 261120   ;;  %vm244_vm2 = vcmask 1041408   ;;  %v838_v24 = vld [vmem:[#allocation7] sm:$0xff] }
  0x29   :  { %v1286_v4 = vld [vmem:[#allocation4] sm:$0x3]  ;;  %v872_v11 = vld [vmem:[%s1358_s9] ss:$0 sm:$0xff]  ;;  %277 = vmatpush.bf16.msra.mxu2 %v838_v24  ;;  %v843_v26 = vld [vmem:[#allocation12 + $0x18] sm:$0xff]  ;;  %vm266_vm3 = vcmask 130048  }
  0x2a   :  { %v171_v8 = vpack.c.bf16 %v1286_v4, %v1286_v4  ;;  %v839_v25 = vld [vmem:[#allocation7 + $0x8] sm:$0xff]  ;;  %v841_v27 = vld [vmem:[#allocation12 + $0x8] sm:$0xff]  ;;  %v842_v36 = vld [vmem:[#allocation12 + $0x10] sm:$0xff]  ;;  %s1175_s13 = smov 96   ;;  %vm630_vm12 = vcmask 254976   ;;  %s697_s19 = sshll.u32 %s1360_s11, 4  ;;  %s698_s19 = int_to_ptr.hbm [resolvable:$true] %s697_s19 }
  0x2b   :  { %308 = vmatpush.bf16.msra.mxu3 %v839_v25  ;;  %v840_v35 = vld [vmem:[#allocation12] sm:$0xff]  ;;  %v847_v37 = vld [vmem:[#allocation13 + $0x18] sm:$0xff]  ;;  %v846_v38 = vld [vmem:[#allocation13 + $0x10] sm:$0xff]  ;;  %s1176_s4 = smov [#allocation17]   ;;  %s711_s22 = sshll.u32 %s1361_s12, 4  ;;  %s712_s22 = int_to_ptr.hbm [resolvable:$true] %s711_s22 }
  0x2c   :  { %205 = vmatpush.bf16.msra.mxu0 %v836_v2  ;;  %233 = vmatpush.bf16.msra.mxu1 %v834_v3  ;;  %v845_v46 = vld [vmem:[#allocation13 + $0x8] sm:$0xff]  ;;  %v844_v49 = vld [vmem:[#allocation13] sm:$0xff]  ;;  %v170_v24 = vld [vmem:[#allocation4 + $0x2] sm:$0x3]  ;;  %s695_s20 = sshll.u32 %s1176_s4, 4  ;;  %s1178_s11 = smov [#allocation16]   ;;  %s696_s20 = int_to_ptr.vmem [resolvable:$true] %s695_s20 }
  0x2d   :  { %s157_s23 = scalar_lea.vmem [#allocation9], %s156_s5  ;;  %349 = vmatpush.bf16.msrb.mxu2 %v843_v26  ;;  %v874_v50 = vld [vmem:[%s1356_s7 + $0x1] ss:$0 sm:$0xff]  ;;  %v875_v61 = vld [vmem:[%s1356_s7] ss:$0 sm:$0xff]  ;;  %v172_v26 = vpack.c.bf16 %v170_v24, %v170_v24  ;;  %s1177_s5 = smov [#allocation19]  }
  0x2e   :  { %v158_v5 = vld [vmem:[%s157_s23] sm:$0x1]  ;;  %s160_s15 = scalar_lea.vmem [#allocation9], %s735_s8  ;;  %v873_v54 = vld [vmem:[%s1358_s9 + $0x1] ss:$0 sm:$0xff]  ;;  %s709_s8 = sshll.u32 %s1177_s5, 4  ;;  %s710_s8 = int_to_ptr.vmem [resolvable:$true] %s709_s8 }
  0x2f   :  { %v161_v6 = vld [vmem:[%s160_s15] sm:$0x1]  ;;  %744 = vmatmul.msk.bf16.vlgmr.msra.gmra.mxu0 %vm194_vm1, %v171_v8  ;;  %374 = vmatpush.bf16.msrb.mxu3 %v841_v27  ;;  %s685_s24 = sshll.u32 %s1178_s11, 4  ;;  %s687_s28 = sshll.u32 %s1359_s10, 4  ;;  %s686_s24 = int_to_ptr.vmem [resolvable:$true] %s685_s24  ;;  %s688_s28 = int_to_ptr.hbm [resolvable:$true] %s687_s28 }
  0x30   :  { %v163_v7 = vrot.slane %v161_v6, 7  ;;  %453 = vmatpush.bf16.msrb.mxu1 %v847_v37  ;;  %425 = vmatpush.bf16.msrb.mxu0 %v845_v46  ;;  %v848_v25 = vld [vmem:[#allocation13 + $0x20] sm:$0xff] }
  0x31   :  { %350 = vmatpush.bf16.msrb.mxu2 %v842_v36 }
  0x32   :  { %v166_v9 = vsel %vm165_vm0, %v158_v5, %v163_v7 }
  0x33   :  { %v167_v10 = vpack.c.bf16 %v166_v9, %v166_v9  ;;  %375 = vmatpush.bf16.msrb.mxu3 %v840_v35 }
  0x34   :  { %454 = vmatpush.bf16.msrb.mxu1 %v846_v38  ;;  %426 = vmatpush.bf16.msrb.mxu0 %v844_v49  ;;  %v877_v38 = vld [vmem:[%s1356_s7 + $0x2] ss:$0 sm:$0xff] }
  0x35   :  { %753 = vmatmul.msk.bf16.vlgmr.msra.gmra.mxu1 %vm194_vm1, %v167_v10 }
  0x45   :  { %801 = vmatmul.msk.bf16.vlgmr.msrb.gmra.mxu1 %vm194_vm1, %v171_v8 }
  0xac   :  { %v207_v12 = vpop.f32.mrf.mxu0 }
  0xb2   :  { %v235_v13 = vpop.f32.mrf.mxu1 }
  0xb3   :  { %v236_v14 = vadd.f32 %v235_v13, %v207_v12 }
  0xb4   :  { %v209_v17 = vpop.f32.mrf.mxu0 }
  0xb5   :  { %v243_v15 = vadd.f32 %v872_v11, %v236_v14 }
  0xb7   :  { %v245_v16 = vsel %vm244_vm2, %v243_v15, -inf }
  0xb8   :  { %246 = vmax.xlane.f32.xlu0 %v245_v16 }
  0xba   :  { %v237_v18 = vpop.f32.mrf.mxu1 }
  0xc2   :  { %v456_v51 = vpop.f32.mrf.mxu1 }
  0xc3   :  { %v457_v52 = vadd.f32 %v874_v50, %v456_v51 }
  0xc5   :  { %481 = vrot.lane.b32.xlu1 %v457_v52, %s1163_s14 }
  0xca   :  { %v458_v53 = vpop.f32.mrf.mxu1 }
 0x12b   :  { %v247_v19 = vpop.xlane.xlu0 %246 }
 0x12c   :  { %v248_v20 = vsub.f32 %v243_v15, %v247_v19 }
 0x12e   :  { %v249_v21 = vmul.f32 1.442695, %v248_v20 }
 0x130   :  { %879 = vpow2.f32 %v249_v21  ;;  %v851_v21 = vld [vmem:[#allocation13 + $0x38] sm:$0xff] }
 0x136   :  { %v880_v22 = vpop.eup %879 }
 0x137   :  { %v251_v23 = vsel %vm244_vm2, %v880_v22, 0.0  ;;  %v482_v13 = vpop.permute.xlu1 %481 }
 0x138   :  { %252 = vadd.xlane.f32.xlu0 %v251_v23  ;;  %v850_v23 = vld [vmem:[#allocation13 + $0x30] sm:$0xff] }
 0x1ab   :  { %v253_v28 = vpop.xlane.xlu0 %252 }
 0x1ac   :  { %881 = vrcp.f32 %v253_v28 }
 0x1b2   :  { %v882_v29 = vpop.eup %881 }
 0x1b3   :  { %v255_v30 = vmul.f32 %v882_v29, %v880_v22  ;;  %v849_v22 = vld [vmem:[#allocation13 + $0x28] sm:$0xff] }
 0x1b5   :  { %v257_v31 = vpack.c.bf16 %v255_v30, %v255_v30  ;;  %256 = vst [vmem:[#allocation19] sm:$0x3] %v255_v30 }
 0x1b7   :  { %758 = vmatmul.msk.bf16.vlgmr.msra.gmra.mxu2 %vm266_vm3, %v257_v31  ;;  %v287_v32 = vunpack.c.l.b16 %v257_v31 }
 0x1b8   :  { %545 = vmatpush.bf16.msra.mxu2 %v849_v22 }
 0x1b9   :  { %v288_v33 = vpack.c.b16 %v287_v32, %v287_v32 }
 0x1bb   :  { %v290_v34 = vshrl.u32 %v288_v33, 16 }
 0x1bc   :  { %546 = vmatpush.bf16.msra.mxu2 %v848_v25 }
 0x1bd   :  { %763 = vmatmul.msk.bf16.vlgmr.msra.gmra.mxu3 %vm266_vm3, %v290_v34 }
 0x1be   :  { %576 = vmatpush.bf16.msra.mxu3 %v851_v21 }
 0x1c2   :  { %577 = vmatpush.bf16.msra.mxu3 %v850_v23 }
 0x1cd   :  { %781 = vmatmul.msk.bf16.vlgmr.msrb.gmra.mxu3 %vm194_vm1, %v167_v10 }
 0x1dd   :  { %822 = vmatmul.msk.bf16.vlgmr.msra.gmra.mxu3 %vm194_vm1, %v172_v26 }
 0x23a   :  { %v279_v39 = vpop.f32.mrf.mxu2 }
 0x240   :  { %v310_v40 = vpop.f32.mrf.mxu3 }
 0x241   :  { %v315_v41 = vrot.slane %v310_v40, 7 }
 0x242   :  { %v281_v42 = vpop.f32.mrf.mxu2 }
 0x243   :  { %v317_v43 = vsel %vm165_vm0, %v279_v39, %v315_v41 }
 0x244   :  { %v322_v44 = vpack.c.bf16 %v317_v43, %v317_v43 }
 0x246   :  { %772 = vmatmul.msk.bf16.vlgmr.msrb.gmra.mxu2 %vm194_vm1, %v322_v44 }
 0x248   :  { %v312_v45 = vpop.f32.mrf.mxu3 }
 0x250   :  { %v377_v47 = vpop.f32.mrf.mxu3 }
 0x258   :  { %v379_v48 = vpop.f32.mrf.mxu3 }
 0x260   :  { %v579_v34 = vpop.f32.mrf.mxu3 }
 0x268   :  { %v581_v37 = vpop.f32.mrf.mxu3 }
 0x2c9   :  { %v352_v55 = vpop.f32.mrf.mxu2 }
 0x2ca   :  { %v378_v56 = vadd.f32 %v377_v47, %v352_v55 }
 0x2cc   :  { %v386_v57 = vadd.f32 %v873_v54, %v378_v56 }
 0x2ce   :  { %v387_v58 = vmax.f32 %v386_v57, 0.0 }
 0x2d0   :  { %v388_v59 = vpack.c.bf16 %v387_v58, %v387_v58 }
 0x2d1   :  { %v354_v60 = vpop.f32.mrf.mxu2 }
 0x2d2   :  { %792 = vmatmul.msk.bf16.vlgmr.msrb.gmra.mxu0 %vm194_vm1, %v388_v59 }
 0x34f   :  { %v428_v62 = vpop.f32.mrf.mxu0 }
 0x350   :  { %v429_v63 = vadd.f32 %v875_v61, %v428_v62 }
 0x352   :  { %v460_v0 = vadd.f32 %v457_v52, %v429_v63 }
 0x354   :  { %v802_v1 = vmul.f32 -1.442695, %v460_v0  ;;  %v852_v0 = vld [vmem:[#allocation15] sm:$0xff] }
 0x356   :  { %883 = vpow2.f32 %v802_v1 }
 0x357   :  { %v430_v2 = vpop.f32.mrf.mxu0 }
 0x35c   :  { %v884_v3 = vpop.eup %883 }
 0x35d   :  { %v464_v5 = vadd.f32 1.0, %v884_v3 }
 0x35f   :  { %885 = vrcp.f32 %v464_v5  ;;  %v476_v9 = vand.u32 2147483648, %v464_v5  ;;  %v474_v11 = vand.u32 2147483647, %v464_v5  ;;  %vm470_vm5 = vweird.f32 %v464_v5 }
 0x361   :  { %v477_v14 = vor.u32 1.1754944e-38, %v476_v9  ;;  %vm475_vm7 = vcmp.eq.f32.partialorder %v474_v11, 8.507059e+37 }
 0x365   :  { %v886_v6 = vpop.eup %885 }
 0x366   :  { %v466_v7 = vmul.f32 %v886_v6, %v464_v5  ;;  %vm471_vm4 = vweird.f32 %v886_v6 }
 0x367   :  { %vm472_vm6 = vmor %vm470_vm5, %vm471_vm4 }
 0x368   :  { %v467_v8 = vsub.f32 1.0, %v466_v7 }
 0x36a   :  { %v468_v10 = vmul.f32 %v886_v6, %v467_v8 }
 0x36c   :  { %v469_v12 = vadd.f32 %v886_v6, %v468_v10  ;;  %v878_v10 = vld [vmem:[%s1358_s9 + $0x2] ss:$0 sm:$0xff] }
 0x36e   :  { %v473_v15 = vsel %vm472_vm6, %v886_v6, %v469_v12 }
 0x36f   :  { %v478_v16 = vsel %vm475_vm7, %v477_v14, %v473_v15 }
 0x370   :  { %v484_v17 = vmul.f32 %v482_v13, %v478_v16  ;;  %v491_v28 = vsub.f32 1.0, %v478_v16 }
 0x372   :  { %486 = vrot.lane.b32.xlu1 %v484_v17, %s1163_s14 }
 0x3e4   :  { %v487_v18 = vpop.permute.xlu1 %486 }
 0x3e5   :  { %v489_v19 = vadd.f32 %v487_v18, %v429_v63  ;;  %v853_v63 = vld [vmem:[#allocation15 + $0x8] sm:$0xff] }
 0x3e6   :  { %672 = vmatpush.bf16.msra.mxu0 %v853_v63 }
 0x3e7   :  { %887 = vtanh.f32 %v489_v19 }
 0x3ea   :  { %673 = vmatpush.bf16.msra.mxu0 %v852_v0 }
 0x3ed   :  { %v888_v20 = vpop.eup %887 }
 0x3ee   :  { %493 = vrot.lane.b32.xlu2 %v888_v20, %s1175_s13 }
 0x3f6   :  { %498 = vrot.lane.b32.xlu2 %v1286_v4, %s1168_s25  ;;  %v876_v4 = vld [vmem:[%s1356_s7 + $0x3] ss:$0 sm:$0xff] }
 0x3f7   :  { %v580_v35 = vadd.f32 %v876_v4, %v579_v34 }
 0x3f9   :  { %604 = vrot.lane.b32.xlu1 %v580_v35, %s1163_s14 }
 0x448   :  { %v494_v27 = vpop.permute.xlu2 %493 }
 0x449   :  { %v496_v30 = vmul.f32 %v494_v27, %v491_v28 }
 0x450   :  { %v499_v29 = vpop.permute.xlu2 %498 }
 0x451   :  { %v501_v31 = vmul.f32 %v499_v29, %v478_v16 }
 0x453   :  { %v502_v32 = vadd.f32 %v501_v31, %v496_v30 }
 0x455   :  { %v503_v33 = vpack.c.bf16 %v502_v32, %v502_v32 }
 0x457   :  { %522 = vrot.lane.b32.xlu0 %v503_v33, %s1175_s13 }
 0x46b   :  { %v605_v53 = vpop.permute.xlu1 %604 }
 0x4c9   :  { %v523_v36 = vpop.permute.xlu0 %522 }
 0x4ca   :  { %813 = vmatmul.msk.bf16.vlgmr.msra.gmra.mxu2 %vm194_vm1, %v523_v36 }
 0x54d   :  { %v548_v39 = vpop.f32.mrf.mxu2 }
 0x54e   :  { %v549_v40 = vadd.f32 %v877_v38, %v548_v39 }
 0x550   :  { %v583_v41 = vadd.f32 %v580_v35, %v549_v40 }
 0x552   :  { %v823_v42 = vmul.f32 -1.442695, %v583_v41 }
 0x554   :  { %889 = vpow2.f32 %v823_v42 }
 0x555   :  { %v550_v43 = vpop.f32.mrf.mxu2 }
 0x55a   :  { %v890_v44 = vpop.eup %889 }
 0x55b   :  { %v587_v45 = vadd.f32 1.0, %v890_v44 }
 0x55d   :  { %891 = vrcp.f32 %v587_v45  ;;  %v599_v49 = vand.u32 2147483648, %v587_v45  ;;  %v597_v51 = vand.u32 2147483647, %v587_v45  ;;  %vm593_vm9 = vweird.f32 %v587_v45 }
 0x55f   :  { %v600_v54 = vor.u32 1.1754944e-38, %v599_v49  ;;  %vm598_vm11 = vcmp.eq.f32.partialorder %v597_v51, 8.507059e+37 }
 0x563   :  { %v892_v46 = vpop.eup %891 }
 0x564   :  { %v589_v47 = vmul.f32 %v892_v46, %v587_v45  ;;  %vm594_vm8 = vweird.f32 %v892_v46 }
 0x565   :  { %vm595_vm10 = vmor %vm593_vm9, %vm594_vm8 }
 0x566   :  { %v590_v48 = vsub.f32 1.0, %v589_v47 }
 0x568   :  { %v591_v50 = vmul.f32 %v892_v46, %v590_v48 }
 0x56a   :  { %v592_v52 = vadd.f32 %v892_v46, %v591_v50 }
 0x56c   :  { %v596_v55 = vsel %vm595_vm10, %v892_v46, %v592_v52 }
 0x56d   :  { %v601_v56 = vsel %vm598_vm11, %v600_v54, %v596_v55 }
 0x56e   :  { %v607_v57 = vmul.f32 %v605_v53, %v601_v56  ;;  %v614_v1 = vsub.f32 1.0, %v601_v56 }
 0x570   :  { %609 = vrot.lane.b32.xlu2 %v607_v57, %s1163_s14 }
 0x578   :  { %621 = vrot.lane.b32.xlu2 %v170_v24, %s1168_s25 }
 0x580   :  { %627 = vrot.lane.b32.xlu2 %v502_v32, %s1175_s13 }
 0x5ca   :  { %v610_v58 = vpop.permute.xlu2 %609 }
 0x5cb   :  { %v612_v59 = vadd.f32 %v610_v58, %v549_v40 }
 0x5cd   :  { %893 = vtanh.f32 %v612_v59 }
 0x5d2   :  { %v622_v60 = vpop.permute.xlu2 %621 }
 0x5d3   :  { %v894_v61 = vpop.eup %893  ;;  %v624_v3 = vmul.f32 %v622_v60, %v601_v56 }
 0x5d4   :  { %616 = vrot.lane.b32.xlu1 %v894_v61, %s1175_s13 }
 0x5da   :  { %v628_v62 = vpop.permute.xlu2 %627 }
 0x5db   :  { %631 = vst.msk [vmem:[#allocation17] sm:$0x3] %vm630_vm12, %v628_v62 }
 0x646   :  { %v617_v2 = vpop.permute.xlu1 %616 }
 0x647   :  { %v619_v5 = vmul.f32 %v617_v2, %v614_v1 }
 0x649   :  { %v625_v6 = vadd.f32 %v624_v3, %v619_v5 }
 0x64b   :  { %633 = vrot.lane.b32.xlu0 %v625_v6, %s1175_s13  ;;  %v638_v7 = vpack.c.bf16 %v625_v6, %v625_v6 }
 0x64d   :  { %649 = vrot.lane.b32.xlu1 %v638_v7, %s1175_s13 }
 0x6bd   :  { %v634_v8 = vpop.permute.xlu0 %633 }
 0x6be   :  { %637 = vst.msk [vmem:[#allocation17 + $0x2] sm:$0x3] %vm630_vm12, %v634_v8 }
 0x6bf   :  { %v650_v9 = vpop.permute.xlu1 %649  ;;  %703 = dma.vmem_to_hbm [thread:$0]  %s696_s20, 64, %s698_s19, [#allocation18], %s1168_s25, %s1168_s25, %s1169_s26  }
 0x6c0   :  { %833 = vmatmul.msk.bf16.vlgmr.msra.gmra.mxu0 %vm194_vm1, %v650_v9  ;;  %714 = dma.vmem_to_hbm [thread:$0]  %s710_s8, 32, %s712_s22, [#allocation18]  }
 0x73d   :  { %v675_v11 = vpop.f32.mrf.mxu0 }
 0x73e   :  { %v676_v12 = vadd.f32 %v878_v10, %v675_v11 }
 0x740   :  { %679 = vst [vmem:[#allocation16] sm:$0x3] %v676_v12 }
 0x741   :  { %690 = dma.vmem_to_hbm [thread:$0]  %s686_s24, 32, %s688_s28, [#allocation6]  }
 0x745   :  { %v677_v13 = vpop.f32.mrf.mxu0 }
 0x746   :  { %1157 = dma.done.wait [#allocation6], 32  }
 0x747   :  { %1158 = vsyncadd [#allocation6], 4294967264 }
 0x748   :  { %1159 = dma.done.wait [#allocation18], 96  }
 0x749   :  { %1160 = vsyncadd [#allocation18], 4294967200 }
 0x74a   :  { %727 = vsyncpa [#allocation5], 1 }
 0x74b   :  { %728 = vsyncpa [#allocation8], 1 }
 0x74c   :  { %729 = vsyncpa [#allocation11], 1 }
 0x74d   :  { %730 = vsyncpa [#allocation14], 1 }
 0x74e   :  { %731 = vsyncpa [#allocation6], 1 }
 0x74f   :  { %732 = vsyncpa [#allocation18], 1 }

</bundles_post_ra>
